<compile_context>
chip_gen: v7x
topology: tpu7x:2x2x1
jax: 0.10.0
libtpu: 0.0.40
codegen_flags: <defaults>
</compile_context>

<pallas_src>
import jax
import jax.numpy as jnp
from jax import lax
from jax.experimental import pallas as pl
from jax.experimental.pallas import tpu as pltpu


def _round_up(v: int, m: int) -> int:
    return ((v + m - 1) // m) * m


def fc_leakyrelu_kernel(x_ref, w_ref, b_ref, o_ref, acc_ref):
    k = pl.program_id(2)

    @pl.when(k == 0)
    def _():
        acc_ref[...] = jnp.zeros_like(acc_ref)

    # x_ref: (tm, tk) bf16, w_ref: (tn, tk) bf16 (PyTorch layout).
    # Contract dim 1 of both -> (tm, tn), accumulated in f32 on the MXU.
    acc_ref[...] += lax.dot_general(
        x_ref[...], w_ref[...],
        dimension_numbers=(((1,), (1,)), ((), ())),
        preferred_element_type=jnp.float32)

    @pl.when(k == pl.num_programs(2) - 1)
    def _():
        y = acc_ref[...] + b_ref[...]      # (1, tn) broadcasts over rows, f32
        y = jnp.maximum(y, 0.2 * y)        # LeakyReLU(0.2) in f32
        o_ref[...] = y.astype(o_ref.dtype)


def fclayer_forward(x, weight, bias, *, tm_cap=256, tn_cap=256, tk_cap=512):
    """x: (B, innodes) f32; weight: (nodes, innodes) f32 (PyTorch layout);
    bias: (nodes,) f32. Returns (B, nodes) in x.dtype."""
    B, innodes = x.shape
    nodes = weight.shape[0]
    out_dtype = x.dtype

    # Tile sizes: lane-dense output (tn multiple of 128), bf16 sublane-packed
    # rows (tm multiple of 16), largest K tile (up to cap) to amortize the
    # per-grid-step overhead. Caps chosen to fit v7x's 64 MiB VMEM comfortably.
    tm = min(_round_up(B, 16), tm_cap)
    tn = min(_round_up(nodes, 128), tn_cap)
    tk = min(_round_up(innodes, 128), tk_cap)

    Mp = _round_up(B, tm)
    Np = _round_up(nodes, tn)
    Kp = _round_up(innodes, tk)

    # bf16 operands for the MXU. TODO(synk): in a real model, store the weight
    # in bf16 (and pre-padded) at init so this cast/pad is not per-call work.
    xb = jnp.pad(x, ((0, Mp - B), (0, Kp - innodes))).astype(jnp.bfloat16)
    wb = jnp.pad(weight, ((0, Np - nodes), (0, Kp - innodes))).astype(jnp.bfloat16)
    b2 = jnp.pad(bias, (0, Np - nodes)).astype(jnp.float32).reshape(1, Np)

    grid = (Mp // tm, Np // tn, Kp // tk)

    out = pl.pallas_call(
        fc_leakyrelu_kernel,
        out_shape=jax.ShapeDtypeStruct((Mp, Np), out_dtype),
        grid=grid,
        in_specs=[
            pl.BlockSpec((tm, tk), lambda i, j, k: (i, k)),   # x tile
            pl.BlockSpec((tn, tk), lambda i, j, k: (j, k)),   # weight tile (PyTorch layout)
            pl.BlockSpec((1, tn), lambda i, j, k: (0, j)),    # bias tile
        ],
        out_specs=pl.BlockSpec((tm, tn), lambda i, j, k: (i, j)),
        scratch_shapes=[pltpu.VMEM((tm, tn), jnp.float32)],
        compiler_params=pltpu.CompilerParams(
            dimension_semantics=("parallel", "parallel", "arbitrary")),
    )(xb, wb, b2)

    return out[:B, :nodes]


if __name__ == "__main__":
    key = jax.random.PRNGKey(0)
    kx, kw, kb, kx2, kw2, kb2 = jax.random.split(key, 6)

    def ref_fwd(x, w, b):
        y = x @ w.T + b
        return jnp.where(y >= 0, y, 0.2 * y)

    # Small shape consistent with the module (single grid step, padded to
    # 16 x 128 lane-dense tiles internally).
    batch, innodes, nodes = 8, 32, 64
    bound = 1.0 / (innodes ** 0.5)
    weight = jax.random.uniform(kw, (nodes, innodes), jnp.float32, -bound, bound)
    bias = jax.random.uniform(kb, (nodes,), jnp.float32, -bound, bound)
    x = jax.random.normal(kx, (batch, innodes), jnp.float32)

    out = jax.block_until_ready(fclayer_forward(x, weight, bias))
    ref = ref_fwd(x, weight, bias)
    assert out.shape == (batch, nodes)
    # bf16 MXU inputs with f32 accumulation -> loosened tolerance vs pure f32.
    assert jnp.allclose(out, ref, atol=5e-2, rtol=5e-2), float(
        jnp.max(jnp.abs(out - ref)))

    # Second shape exercising the K-accumulation loop and N tiling
    # (grid = (1, 2, 2) with tm=32, tn=256, tk=512).
    B2, IN2, N2 = 32, 1024, 512
    bound2 = 1.0 / (IN2 ** 0.5)
    w2 = jax.random.uniform(kw2, (N2, IN2), jnp.float32, -bound2, bound2)
    b2 = jax.random.uniform(kb2, (N2,), jnp.float32, -bound2, bound2)
    x2 = jax.random.normal(kx2, (B2, IN2), jnp.float32)

    out2 = jax.block_until_ready(fclayer_forward(x2, w2, b2))
    ref2 = ref_fwd(x2, w2, b2)
    assert out2.shape == (B2, N2)
    assert jnp.allclose(out2, ref2, atol=5e-2, rtol=5e-2), float(
        jnp.max(jnp.abs(out2 - ref2)))

    print("KERNEL_OK")
</pallas_src>

<mosaic_0001>
module attributes {stable_mosaic.version = 11 : i64} {
  func.func @fc_leakyrelu_kernel(%arg0: i32, %arg1: i32, %arg2: i32, %arg3: memref<16x128xbf16, #tpu.memory_space<vmem>>, %arg4: memref<128x128xbf16, #tpu.memory_space<vmem>>, %arg5: memref<1x128xf32, #tpu.memory_space<vmem>>, %arg6: memref<16x128xf32, #tpu.memory_space<vmem>>, %arg7: memref<16x128xf32, #tpu.memory_space<vmem>>) attributes {dimension_semantics = [#tpu.dimension_semantics<parallel>, #tpu.dimension_semantics<parallel>, #tpu.dimension_semantics<arbitrary>], iteration_bounds = array<i64: 1, 1, 1>, scalar_prefetch = 0 : i64, scratch_operands = 1 : i64, tpu.core_type = #tpu.core_type<tc>, window_params = [{transform_indices = @transform_0, window_bounds = array<i64: 16, 128>}, {transform_indices = @transform_1, window_bounds = array<i64: 128, 128>}, {transform_indices = @transform_2, window_bounds = array<i64: 1, 128>}, {transform_indices = @transform_3, window_bounds = array<i64: 16, 128>}]} {
    %c0_i32 = arith.constant 0 : i32
    %0 = arith.cmpi eq, %arg2, %c0_i32 : i32
    %1 = arith.extui %0 : i1 to i32
    %c0_i32_0 = arith.constant 0 : i32
    %2 = arith.cmpi ne, %1, %c0_i32_0 : i32
    scf.if %2 {
      %cst_10 = arith.constant 0.000000e+00 : f32
      %12 = vector.broadcast %cst_10 : f32 to vector<16x128xf32>
      %c0_11 = arith.constant 0 : index
      %c0_12 = arith.constant 0 : index
      %13 = vector.load %arg7[%c0_11, %c0_12] : memref<16x128xf32, #tpu.memory_space<vmem>>, vector<16x128xf32>
      tpu.vector_store %arg7[%c0_11, %c0_12], %12 {strides = array<i32>} : memref<16x128xf32, #tpu.memory_space<vmem>>, vector<16x128xf32>,
    } else {
    }
    %c0 = arith.constant 0 : index
    %c0_1 = arith.constant 0 : index
    %3 = vector.load %arg7[%c0, %c0_1] : memref<16x128xf32, #tpu.memory_space<vmem>>, vector<16x128xf32>
    %c0_2 = arith.constant 0 : index
    %c0_3 = arith.constant 0 : index
    %4 = vector.load %arg3[%c0_2, %c0_3] : memref<16x128xbf16, #tpu.memory_space<vmem>>, vector<16x128xbf16>
    %c0_4 = arith.constant 0 : index
    %c0_5 = arith.constant 0 : index
    %5 = vector.load %arg4[%c0_4, %c0_5] : memref<128x128xbf16, #tpu.memory_space<vmem>>, vector<128x128xbf16>
    %cst = arith.constant dense<0.000000e+00> : vector<16x128xf32>
    %6 = tpu.matmul %4, %5, %cst {dimension_numbers = #tpu.dot_dimension_numbers<[1], [1], [0], [0], [0, 0, 1, 0], [], []>} : vector<16x128xbf16>, vector<128x128xbf16>, vector<16x128xf32> -> vector<16x128xf32>
    %7 = arith.addf %3, %6 : vector<16x128xf32>
    %c0_6 = arith.constant 0 : index
    %c0_7 = arith.constant 0 : index
    %8 = vector.load %arg7[%c0_6, %c0_7] : memref<16x128xf32, #tpu.memory_space<vmem>>, vector<16x128xf32>
    tpu.vector_store %arg7[%c0_6, %c0_7], %7 {strides = array<i32>} : memref<16x128xf32, #tpu.memory_space<vmem>>, vector<16x128xf32>,
    %c0_i32_8 = arith.constant 0 : i32
    %9 = arith.cmpi eq, %arg2, %c0_i32_8 : i32
    %10 = arith.extui %9 : i1 to i32
    %c0_i32_9 = arith.constant 0 : i32
    %11 = arith.cmpi ne, %10, %c0_i32_9 : i32
    scf.if %11 {
      %c0_10 = arith.constant 0 : index
      %c0_11 = arith.constant 0 : index
      %12 = vector.load %arg7[%c0_10, %c0_11] : memref<16x128xf32, #tpu.memory_space<vmem>>, vector<16x128xf32>
      %c0_12 = arith.constant 0 : index
      %c0_13 = arith.constant 0 : index
      %13 = vector.load %arg5[%c0_12, %c0_13] : memref<1x128xf32, #tpu.memory_space<vmem>>, vector<1x128xf32>
      %14 = vector.broadcast %13 : vector<1x128xf32> to vector<16x128xf32>
      %15 = arith.addf %12, %14 : vector<16x128xf32>
      %cst_14 = arith.constant 2.000000e-01 : f32
      %16 = vector.broadcast %cst_14 : f32 to vector<16x128xf32>
      %17 = arith.mulf %16, %15 : vector<16x128xf32>
      %18 = arith.maximumf %15, %17 : vector<16x128xf32>
      %c0_15 = arith.constant 0 : index
      %c0_16 = arith.constant 0 : index
      %19 = vector.load %arg6[%c0_15, %c0_16] : memref<16x128xf32, #tpu.memory_space<vmem>>, vector<16x128xf32>
      tpu.vector_store %arg6[%c0_15, %c0_16], %18 {strides = array<i32>} : memref<16x128xf32, #tpu.memory_space<vmem>>, vector<16x128xf32>,
    } else {
    }
    return
  }
  func.func @transform_0(%arg0: i32, %arg1: i32, %arg2: i32) -> (i32, i32) {
    %c0_i32 = arith.constant 0 : i32
    return %arg0, %arg2 : i32, i32
  }
  func.func @transform_1(%arg0: i32, %arg1: i32, %arg2: i32) -> (i32, i32) {
    %c0_i32 = arith.constant 0 : i32
    return %arg1, %arg2 : i32, i32
  }
  func.func @transform_2(%arg0: i32, %arg1: i32, %arg2: i32) -> (i32, i32) {
    %c0_i32 = arith.constant 0 : i32
    %c0_i32_0 = arith.constant 0 : i32
    return %c0_i32, %arg1 : i32, i32
  }
  func.func @transform_3(%arg0: i32, %arg1: i32, %arg2: i32) -> (i32, i32) {
    %c0_i32 = arith.constant 0 : i32
    return %arg0, %arg1 : i32, i32
  }
}

</mosaic_0001>

<bundles_post_ra>
// kernel: tpu_custom_call.1
= control target key start
LH: loop header
LB: loop body
LE: loop exit
PB: predicated region body
PF: predicated region fallthrough
CT: control target
= control target key end

     0   :  { %8 = vsyncpa [#allocation4], 0  ;;  %s404_s0 = inlined_call_operand.hbm [shape: bf16[16,128], index: 0, kind: input, shape index: {}]   ;;  %s405_s1 = inlined_call_operand.hbm [shape: bf16[128,128], index: 1, kind: input, shape index: {}]   ;;  %s406_s2 = inlined_call_operand.vmem [shape: f32[1,128], index: 2, kind: input, shape index: {}]   ;;  %s407_s3 = inlined_call_operand.hbm [shape: f32[16,128], index: 3, kind: output, shape index: {}]  }
   0x1   :  { %9 = vsyncpa [#allocation7], 0 }
   0x2   :  { %10 = vsyncpa [#allocation5], 0  ;;  %s336_s12 = smov [#allocation3]   ;;  %s264_s16 = scalar_lea.hbm %s404_s0, 128 }
   0x3   :  { %s16_s13 = sshll.u32 %s336_s12, 4  ;;  %p265_p0 = scmp.ne.s32.totalorder %s404_s0, %s264_s16  ;;  %s17_s13 = int_to_ptr.vmem [resolvable:$true] %s16_s13 }
   0x4   :  { %p268_p1 = scmp.lt.u32.totalorder %s264_s16, %s404_s0 }
   0x6   :  { %p270_p2 = pnand %p268_p1, %p265_p0 }
   0x8   :  { %273 = shalt.err (!%p270_p2)
}
   0x9   :  { %s274_s21 = scalar_lea.vmem %s17_s13, 128  ;;  %p279_p4 = scmp.lt.s32.totalorder %s17_s13, %s17_s13 }
   0xa   :  { %p275_p3 = scmp.ne.s32.totalorder %s17_s13, %s274_s21  ;;  %p280_p5 = scmp.lt.s32.totalorder %s274_s21, %s274_s21 }
   0xc   :  { %p281_p6 = por %p280_p5, %p279_p4 }
   0xe   :  { %p282_p7 = pnand %p281_p6, %p275_p3 }
  0x10   :  { %285 = shalt.err (!%p282_p7)
}
  0x11   :  { %s337_s22 = smov 64   ;;  %s338_s23 = smov 4  }
  0x12   :  { %22 = dma.hbm_to_vmem [thread:$0]  %s404_s0, 128, %s17_s13, [#allocation4], %s337_s22, %s337_s22, %s338_s23  }
  0x13   :  { %s339_s26 = smov [#allocation6]   ;;  %s286_s30 = scalar_lea.hbm %s405_s1, 1024 }
  0x14   :  { %s28_s27 = sshll.u32 %s339_s26, 4  ;;  %p287_p8 = scmp.ne.s32.totalorder %s405_s1, %s286_s30  ;;  %s29_s27 = int_to_ptr.vmem [resolvable:$true] %s28_s27 }
  0x15   :  { %p290_p9 = scmp.lt.u32.totalorder %s286_s30, %s405_s1 }
  0x17   :  { %p292_p10 = pnand %p290_p9, %p287_p8 }
  0x19   :  { %295 = shalt.err (!%p292_p10)
}
  0x1a   :  { %s296_s8 = scalar_lea.vmem %s29_s27, 1024  ;;  %p301_p12 = scmp.lt.s32.totalorder %s29_s27, %s29_s27 }
  0x1b   :  { %p297_p11 = scmp.ne.s32.totalorder %s29_s27, %s296_s8  ;;  %p302_p13 = scmp.lt.s32.totalorder %s296_s8, %s296_s8 }
  0x1d   :  { %p303_p0 = por %p302_p13, %p301_p12 }
  0x1f   :  { %p304_p1 = pnand %p303_p0, %p297_p11 }
  0x21   :  { %307 = shalt.err (!%p304_p1)
}
  0x22   :  { %34 = dma.hbm_to_vmem [thread:$0]  %s405_s1, 1024, %s29_s27, [#allocation7], %s337_s22, %s337_s22, %s338_s23  }
  0x23   :  { %330 = dma.done.wait [#allocation4], 128  }
  0x24   :  { %331 = vsyncadd [#allocation4], 4294967168 }
  0x25   :  { %332 = dma.done.wait [#allocation7], 1024  }
  0x26   :  { %333 = vsyncadd [#allocation7], 4294966272  ;;  %v340_v0 = vmov 0.0   ;;  %vm341_vm0 = vmmov 0   ;;  %v255_v1 = vld [vmem:[#allocation6] sm:$0xff]   ;;  %v256_v2 = vld [vmem:[#allocation6 + $0x8] sm:$0xff]  }
  0x27   :  { %226 = vmatprep.subr.bf16.mxu0 %v340_v0  ;;  %242 = vmatprep.mubr.msk.bf16.mxu0 %vm341_vm0, %v340_v0  ;;  %v257_v3 = vld [vmem:[#allocation6 + $0x10] sm:$0xff]   ;;  %v258_v4 = vld [vmem:[#allocation6 + $0x18] sm:$0xff]   ;;  %v259_v5 = vld [vmem:[#allocation6 + $0x20] sm:$0xff]   ;;  %s342_s11 = smov [#allocation8]  }
  0x28   :  { %227 = vmatpush3.bf16.xpose.msra.mxu0 %v255_v1  ;;  %v260_v6 = vld [vmem:[#allocation6 + $0x28] sm:$0xff]   ;;  %v261_v7 = vld [vmem:[#allocation6 + $0x30] sm:$0xff]   ;;  %v262_v8 = vld [vmem:[#allocation6 + $0x38] sm:$0xff]   ;;  %s194_s12 = sshll.u32 %s342_s11, 4  ;;  %s195_s12 = int_to_ptr.vmem [resolvable:$true] %s194_s12 }
  0x29   :  { %228 = vmatprep.subr.bf16.mxu0 %v340_v0  ;;  %v263_v9 = vld [vmem:[#allocation3] sm:$0xff]   ;;  %s308_s13 = scalar_lea.vmem %s195_s12, 256  ;;  %p313_p3 = scmp.lt.s32.totalorder %s195_s12, %s195_s12 }
  0x2a   :  { %v216_v10 = vld [vmem:[%s406_s2] ss:$0 sm:$0xff]  ;;  %p309_p2 = scmp.ne.s32.totalorder %s195_s12, %s308_s13  ;;  %p314_p4 = scmp.lt.s32.totalorder %s308_s13, %s308_s13 }
  0x2c   :  { %p315_p5 = por %p314_p4, %p313_p3 }
  0x2e   :  { %p316_p6 = pnand %p315_p5, %p309_p2 }
  0x30   :  { %229 = vmatpush3.bf16.xpose.msra.mxu0 %v256_v2 }
  0x31   :  { %230 = vmatprep.subr.bf16.mxu0 %v340_v0 }
  0x38   :  { %231 = vmatpush3.bf16.xpose.msra.mxu0 %v257_v3 }
  0x39   :  { %232 = vmatprep.subr.bf16.mxu0 %v340_v0 }
  0x40   :  { %233 = vmatpush3.bf16.xpose.msra.mxu0 %v258_v4 }
  0x41   :  { %234 = vmatprep.subr.bf16.mxu0 %v340_v0 }
  0x48   :  { %235 = vmatpush3.bf16.xpose.msra.mxu0 %v259_v5 }
  0x49   :  { %236 = vmatprep.subr.bf16.mxu0 %v340_v0 }
  0x50   :  { %237 = vmatpush3.bf16.xpose.msra.mxu0 %v260_v6 }
  0x51   :  { %238 = vmatprep.subr.bf16.mxu0 %v340_v0 }
  0x58   :  { %239 = vmatpush3.bf16.xpose.msra.mxu0 %v261_v7 }
  0x59   :  { %240 = vmatprep.subr.bf16.mxu0 %v340_v0 }
  0x60   :  { %241 = vmatpush3.bf16.xpose.msra.mxu0 %v262_v8 }
  0x67   :  { %243 = vmatmul.mubr.bf16.vlgmr.msra.gmra.mrb[0].mxu0 %v263_v9 }
 0x13a   :  { %v158_v11 = vpop.f32.mrb[0].mxu0 }
 0x13b   :  { %v181_v12 = vadd.f32 %v216_v10, %v158_v11  ;;  %v244_v13 = vpop.f32.mrb[1].mxu0 }
 0x13c   :  { %v161_v14 = vpop.f32.mrb[2].mxu0 }
 0x13d   :  { %v183_v15 = vmul.f32 0.2, %v181_v12  ;;  %v182_v16 = vadd.f32 %v216_v10, %v161_v14  ;;  %v245_v17 = vpop.f32.mrb[3].mxu0 }
 0x13f   :  { %v185_v18 = vmax.f32 %v181_v12, %v183_v15  ;;  %v184_v19 = vmul.f32 0.2, %v182_v16 }
 0x141   :  { %187 = vst [vmem:[#allocation8] sm:$0xff] %v185_v18  ;;  %v186_v20 = vmax.f32 %v182_v16, %v184_v19 }
 0x143   :  { %188 = vst [vmem:[#allocation8 + $0x8] sm:$0xff] %v186_v20 }
 0x144   :  { %319 = shalt.err (!%p316_p6)
}
 0x145   :  { %s320_s15 = scalar_lea.hbm %s407_s3, 256 }
 0x146   :  { %p321_p7 = scmp.ne.s32.totalorder %s407_s3, %s320_s15  ;;  %p324_p8 = scmp.lt.u32.totalorder %s320_s15, %s407_s3 }
 0x148   :  { %p326_p9 = pnand %p324_p8, %p321_p7 }
 0x14a   :  { %329 = shalt.err (!%p326_p9)
}
 0x14b   :  { %s343_s20 = smov 128   ;;  %s344_s21 = smov 8  }
 0x14c   :  { %200 = dma.vmem_to_hbm [thread:$0]  %s195_s12, 256, %s407_s3, [#allocation5], %s343_s20, %s343_s20, %s344_s21  }
 0x14d   :  { %334 = dma.done.wait [#allocation5], 256  }
 0x14e   :  { %335 = vsyncadd [#allocation5], 4294967040 }
 0x14f   :  { %204 = vsyncpa [#allocation4], 1 }
 0x150   :  { %205 = vsyncpa [#allocation7], 1 }
 0x151   :  { %206 = vsyncpa [#allocation5], 1 }

</bundles_post_ra>
